<compile_context>
chip_gen: v5e
topology: v5e:2x2
jax: 0.10.0
libtpu: 0.0.40
codegen_flags: <defaults>
</compile_context>

<pallas_src>
import functools

import jax
import jax.numpy as jnp
from jax import lax
from jax.experimental import pallas as pl
from jax.experimental.pallas import tpu as pltpu


# ----------------------------- Pallas kernels ------------------------------

def _sr_proj_kernel(x_ref, w_ref, b1_ref, b2_ref, o_ref):
    # x_ref : (C, Ms)  depthwise-sr-conv output (BN1 scale already folded into
    #                  the conv weights); b1_ref: (C,1) BN1 shift.
    # w_ref : (C, C)   sr2 1x1 weights with BN2 scale folded in; b2_ref: (C,1).
    t = jnp.maximum(x_ref[...] + b1_ref[...], 0.0)            # ReLU(BN1(.))
    o_ref[...] = (
        jnp.dot(w_ref[...], t, preferred_element_type=jnp.float32) + b2_ref[...]
    )


def sr_project(x, w, b1, b2):
    """Fused relu(BN1) + folded sr2 1x1 conv (+BN2). grid=(B,), parallel."""
    B, C, Ms = x.shape
    return pl.pallas_call(
        _sr_proj_kernel,
        out_shape=jax.ShapeDtypeStruct((B, C, Ms), jnp.float32),
        grid=(B,),
        in_specs=[
            pl.BlockSpec((None, C, Ms), lambda b: (b, 0, 0)),
            pl.BlockSpec((C, C), lambda b: (0, 0)),
            pl.BlockSpec((C, 1), lambda b: (0, 0)),
            pl.BlockSpec((C, 1), lambda b: (0, 0)),
        ],
        out_specs=pl.BlockSpec((None, C, Ms), lambda b: (b, 0, 0)),
        compiler_params=pltpu.CompilerParams(dimension_semantics=("parallel",)),
    )(x, w, b1, b2)


def _fused_attn_kernel(x_ref, s_ref, lc_ref, qw_ref, qb_ref, kvw_ref, kvb_ref,
                       o_ref, *, head_num, scale):
    # Per-batch fused: residual + kv proj + q proj + multi-head attention.
    C, N = x_ref.shape
    hd = C // head_num

    # q = Wq @ x + bq                       (C, N)
    q = jnp.dot(qw_ref[...], x_ref[...], preferred_element_type=jnp.float32)
    q = q + qb_ref[...]

    # kv = Wkv @ (local_conv(s) + s) + bkv' (2C, Ms); local_conv bias folded
    # into kvb in the wrapper.
    kv_in = lc_ref[...] + s_ref[...]
    kv = jnp.dot(kvw_ref[...], kv_in, preferred_element_type=jnp.float32)
    kv = kv + kvb_ref[...]
    k = kv[:C, :]                          # (C, Ms)
    v = kv[C:, :]                          # (C, Ms)

    for h in range(head_num):              # static unroll; data stays in vregs
        lo, hi = h * hd, (h + 1) * hd
        qh = q[lo:hi, :]                   # (hd, N)
        kh = k[lo:hi, :]                   # (hd, Ms)
        vh = v[lo:hi, :]                   # (hd, Ms)
        # scores[n, m] = sum_d qh[d, n] * kh[d, m]  (contract hd on both sides:
        # MXU handles the transposed lhs, no data transpose needed).
        sc = lax.dot_general(qh, kh, (((0,), (0,)), ((), ())),
                             preferred_element_type=jnp.float32) * scale
        sc = sc - jnp.max(sc, axis=-1, keepdims=True)
        e = jnp.exp(sc)
        inv = pl.reciprocal(jnp.sum(e, axis=-1, keepdims=True), approx=True)
        prob = e * inv                     # (N, Ms)
        # out[d, n] = sum_m vh[d, m] * prob[n, m]  -> channel-major (hd, N),
        # so the wrapper reshape to NCHW needs no transpose.
        out_h = lax.dot_general(vh, prob, (((1,), (1,)), ((), ())),
                                preferred_element_type=jnp.float32)
        o_ref[lo:hi, :] = out_h


def fused_attention(xf, s, lc, q_w, q_b, kv_w, kv_b, *, head_num, scale):
    B, C, N = xf.shape
    Ms = s.shape[2]
    kernel = functools.partial(_fused_attn_kernel, head_num=head_num, scale=scale)
    return pl.pallas_call(
        kernel,
        out_shape=jax.ShapeDtypeStruct((B, C, N), jnp.float32),
        grid=(B,),
        in_specs=[
            pl.BlockSpec((None, C, N), lambda b: (b, 0, 0)),
            pl.BlockSpec((None, C, Ms), lambda b: (b, 0, 0)),
            pl.BlockSpec((None, C, Ms), lambda b: (b, 0, 0)),
            pl.BlockSpec((C, C), lambda b: (0, 0)),
            pl.BlockSpec((C, 1), lambda b: (0, 0)),
            pl.BlockSpec((2 * C, C), lambda b: (0, 0)),
            pl.BlockSpec((2 * C, 1), lambda b: (0, 0)),
        ],
        out_specs=pl.BlockSpec((None, C, N), lambda b: (b, 0, 0)),
        compiler_params=pltpu.CompilerParams(dimension_semantics=("parallel",)),
    )(xf, s, lc, q_w, q_b, kv_w, kv_b)


# ------------------------------- JAX glue ----------------------------------

def nearest_resize(x, out_h, out_w):
    # Matches F.interpolate(mode='nearest'): src = floor(dst * in / out).
    B, C, H, W = x.shape
    hi = (jnp.arange(out_h) * H) // out_h
    wi = (jnp.arange(out_w) * W) // out_w
    return x[:, :, hi[:, None], wi[None, :]]


def depthwise_conv(x, w, stride, padding, bias=None):
    # TODO(synk): depthwise (grouped) convs left in lax.conv_general_dilated;
    # no clean Pallas win at these tiny spatial sizes.
    out = lax.conv_general_dilated(
        x, w,
        window_strides=(stride, stride),
        padding=[(padding, padding), (padding, padding)],
        dimension_numbers=("NCHW", "OIHW", "NCHW"),
        feature_group_count=x.shape[1],
    )
    if bias is not None:
        out = out + bias.reshape(1, -1, 1, 1)
    return out


def batchnorm_eval(x, gamma, beta, mean, var, eps=1e-5):
    inv = (gamma / jnp.sqrt(var + eps)).reshape(1, -1, 1, 1)
    return (x - mean.reshape(1, -1, 1, 1)) * inv + beta.reshape(1, -1, 1, 1)


@functools.partial(jax.jit, static_argnames=("head_num", "sr_ratio"))
def attention_forward(p, x, *, head_num, sr_ratio):
    eps = 1e-5
    origin_h, origin_w = x.shape[2], x.shape[3]
    xs = nearest_resize(x, origin_h // 4, origin_w // 4)
    B, C, H, W = xs.shape
    N = H * W
    hd = C // head_num
    scale = float(hd) ** (-0.5)

    # ---- trace-time folding: BN1/BN2 + local_conv bias into conv weights ----
    a1 = p["bn1_g"] / jnp.sqrt(p["bn1_v"] + eps)
    b1 = p["bn1_b"] - p["bn1_m"] * a1
    sr1_w = p["sr1_w"] * a1[:, None, None, None]      # depthwise: per-channel scale
    a2 = p["bn2_g"] / jnp.sqrt(p["bn2_v"] + eps)
    b2 = p["bn2_b"] - p["bn2_m"] * a2
    sr2_w = p["sr2_w"].reshape(C, C) * a2[:, None]
    q_w = p["q_w"].reshape(C, C)
    q_b = p["q_b"].reshape(C, 1)
    kv_w = p["kv_w"].reshape(2 * C, C)
    kv_b = (p["kv_b"] + kv_w @ p["local_b"]).reshape(2 * C, 1)

    # sr[0] depthwise conv (BN1 scale folded into its weights).
    dw = depthwise_conv(xs, sr1_w, stride=sr_ratio, padding=sr_ratio // 2)
    Hs, Ws = dw.shape[2], dw.shape[3]
    Ms = Hs * Ws

    # Pallas A: relu(BN1) + folded sr2 1x1 conv (+BN2).
    s_flat = sr_project(dw.reshape(B, C, Ms), sr2_w,
                        b1.reshape(C, 1), b2.reshape(C, 1))

    # local_conv depthwise 3x3 (its bias is folded into kv_b above).
    lc = depthwise_conv(s_flat.reshape(B, C, Hs, Ws), p["local_w"],
                        stride=1, padding=1)

    # Pallas B: residual + kv/q 1x1 projections + full multi-head attention.
    out = fused_attention(xs.reshape(B, C, N), s_flat, lc.reshape(B, C, Ms),
                          q_w, q_b, kv_w, kv_b, head_num=head_num, scale=scale)
    out = out.reshape(B, C, H, W)          # pure reshape, no transpose
    # NOTE: PyTorch code passes size=(origin_w, origin_h) (swapped) — reproduced.
    out = nearest_resize(out, origin_w, origin_h)
    return out


# --------------------------- pure-JAX reference ------------------------------

def reference_forward(p, x, head_num, sr_ratio):
    origin_h, origin_w = x.shape[2], x.shape[3]
    xs = nearest_resize(x, origin_h // 4, origin_w // 4)
    B, C, H, W = xs.shape
    hd = C // head_num
    scale = float(hd) ** (-0.5)

    def pw(inp, w, b):
        wo = w.reshape(w.shape[0], w.shape[1])
        return jnp.einsum("oc,bchw->bohw", wo, inp) + b.reshape(1, -1, 1, 1)

    q = pw(xs, p["q_w"], p["q_b"])
    kv = depthwise_conv(xs, p["sr1_w"], stride=sr_ratio, padding=sr_ratio // 2)
    kv = jax.nn.relu(
        batchnorm_eval(kv, p["bn1_g"], p["bn1_b"], p["bn1_m"], p["bn1_v"]))
    kv = pw(kv, p["sr2_w"], jnp.zeros((C,), jnp.float32))
    kv = batchnorm_eval(kv, p["bn2_g"], p["bn2_b"], p["bn2_m"], p["bn2_v"])
    kv = depthwise_conv(kv, p["local_w"], stride=1, padding=1,
                        bias=p["local_b"]) + kv
    kv = pw(kv, p["kv_w"], p["kv_b"])

    q = q.reshape(B, head_num, hd, H * W).transpose(0, 1, 3, 2)
    k, v = jnp.split(kv, 2, axis=1)
    M = k.shape[2] * k.shape[3]
    k = k.reshape(B, head_num, hd, M)
    v = v.reshape(B, head_num, hd, M).transpose(0, 1, 3, 2)
    attn = jax.nn.softmax(jnp.matmul(q, k) * scale, axis=-1)
    out = jnp.matmul(attn, v).transpose(0, 1, 3, 2).reshape(B, C, H, W)
    return nearest_resize(out, origin_w, origin_h)


# ---------------------------------- params -----------------------------------

def init_params(key, inplanes, sr_ratio):
    C = inplanes
    ks = jax.random.split(key, 12)

    def nrm(k, shape, s=0.05):
        return s * jax.random.normal(k, shape, dtype=jnp.float32)

    p = {}
    p["q_w"] = nrm(ks[0], (C, C, 1, 1))
    p["q_b"] = nrm(ks[1], (C,))
    p["kv_w"] = nrm(ks[2], (2 * C, C, 1, 1))
    p["kv_b"] = nrm(ks[3], (2 * C,))
    # sr block 1: depthwise conv (groups=C, bias=False) + BN + ReLU
    p["sr1_w"] = nrm(ks[4], (C, 1, sr_ratio, sr_ratio))
    p["bn1_g"] = 1.0 + nrm(ks[5], (C,))
    p["bn1_b"] = nrm(ks[6], (C,))
    p["bn1_m"] = nrm(ks[7], (C,))
    p["bn1_v"] = 1.0 + jnp.abs(nrm(ks[8], (C,)))
    # sr block 2: 1x1 conv (bias=False) + BN (no act)
    p["sr2_w"] = nrm(ks[9], (C, C, 1, 1))
    p["bn2_g"] = jnp.ones((C,), jnp.float32)
    p["bn2_b"] = jnp.zeros((C,), jnp.float32)
    p["bn2_m"] = jnp.zeros((C,), jnp.float32)
    p["bn2_v"] = jnp.ones((C,), jnp.float32)
    # local_conv: depthwise 3x3 with bias
    p["local_w"] = nrm(ks[10], (C, 1, 3, 3))
    p["local_b"] = nrm(ks[11], (C,))
    return p


# ----------------------------------- main ------------------------------------

if __name__ == "__main__":
    key = jax.random.PRNGKey(0)
    kx, kp = jax.random.split(key)

    B, C, Hh, Ww = 2, 16, 16, 16
    head_num, sr_ratio = 4, 2

    x = jax.random.normal(kx, (B, C, Hh, Ww), dtype=jnp.float32)
    params = init_params(kp, C, sr_ratio)

    out = attention_forward(params, x, head_num=head_num, sr_ratio=sr_ratio)
    out = jax.block_until_ready(out)

    ref = reference_forward(params, x, head_num, sr_ratio)
    ref = jax.block_until_ready(ref)

    assert out.shape == (B, C, Ww, Hh), out.shape
    max_err = float(jnp.max(jnp.abs(out - ref)))
    # Tolerance loosened from 1e-4: softmax denominator uses the EUP approximate
    # reciprocal (pl.reciprocal(..., approx=True)) per the perf feedback.
    assert jnp.allclose(out, ref, atol=2e-3, rtol=2e-3), max_err
    print("KERNEL_OK")
</pallas_src>

<mosaic_0001>
module attributes {stable_mosaic.version = 11 : i64} {
  func.func @_sr_proj_kernel(%arg0: i32, %arg1: memref<1x16x9xf32, #tpu.memory_space<vmem>>, %arg2: memref<16x16xf32, #tpu.memory_space<vmem>>, %arg3: memref<16x1xf32, #tpu.memory_space<vmem>>, %arg4: memref<16x1xf32, #tpu.memory_space<vmem>>, %arg5: memref<1x16x9xf32, #tpu.memory_space<vmem>>) attributes {dimension_semantics = [#tpu.dimension_semantics<parallel>], iteration_bounds = array<i64: 2>, scalar_prefetch = 0 : i64, scratch_operands = 0 : i64, tpu.core_type = #tpu.core_type<tc>, window_params = [{transform_indices = @transform_0, window_bounds = array<i64: 1, 16, 9>}, {pipeline_mode = #tpu.pipeline_mode<synchronous>, transform_indices = @transform_1, window_bounds = array<i64: 16, 16>}, {pipeline_mode = #tpu.pipeline_mode<synchronous>, transform_indices = @transform_2, window_bounds = array<i64: 16, 1>}, {pipeline_mode = #tpu.pipeline_mode<synchronous>, transform_indices = @transform_3, window_bounds = array<i64: 16, 1>}, {transform_indices = @transform_4, window_bounds = array<i64: 1, 16, 9>}]} {
    %c0 = arith.constant 0 : index
    %c0_0 = arith.constant 0 : index
    %c0_1 = arith.constant 0 : index
    %0 = vector.load %arg1[%c0, %c0_0, %c0_1] : memref<1x16x9xf32, #tpu.memory_space<vmem>>, vector<1x16x9xf32>
    %1 = vector.shape_cast %0 : vector<1x16x9xf32> to vector<16x9xf32>
    %c0_2 = arith.constant 0 : index
    %c0_3 = arith.constant 0 : index
    %2 = vector.load %arg3[%c0_2, %c0_3] : memref<16x1xf32, #tpu.memory_space<vmem>>, vector<16x1xf32>
    %3 = vector.broadcast %2 : vector<16x1xf32> to vector<16x9xf32>
    %4 = arith.addf %1, %3 : vector<16x9xf32>
    %cst = arith.constant 0.000000e+00 : f32
    %5 = vector.broadcast %cst : f32 to vector<16x9xf32>
    %6 = arith.maximumf %4, %5 : vector<16x9xf32>
    %c0_4 = arith.constant 0 : index
    %c0_5 = arith.constant 0 : index
    %7 = vector.load %arg2[%c0_4, %c0_5] : memref<16x16xf32, #tpu.memory_space<vmem>>, vector<16x16xf32>
    %cst_6 = arith.constant dense<0.000000e+00> : vector<16x9xf32>
    %8 = tpu.matmul %7, %6, %cst_6 {dimension_numbers = #tpu.dot_dimension_numbers<[1], [0], [0], [1], [0, 0, 1, 1], [], []>} : vector<16x16xf32>, vector<16x9xf32>, vector<16x9xf32> -> vector<16x9xf32>
    %c0_7 = arith.constant 0 : index
    %c0_8 = arith.constant 0 : index
    %9 = vector.load %arg4[%c0_7, %c0_8] : memref<16x1xf32, #tpu.memory_space<vmem>>, vector<16x1xf32>
    %10 = vector.broadcast %9 : vector<16x1xf32> to vector<16x9xf32>
    %11 = arith.addf %8, %10 : vector<16x9xf32>
    %c0_9 = arith.constant 0 : index
    %c0_10 = arith.constant 0 : index
    %c0_11 = arith.constant 0 : index
    %12 = vector.load %arg5[%c0_9, %c0_10, %c0_11] : memref<1x16x9xf32, #tpu.memory_space<vmem>>, vector<1x16x9xf32>
    %13 = vector.shape_cast %12 : vector<1x16x9xf32> to vector<16x9xf32>
    %14 = vector.shape_cast %11 : vector<16x9xf32> to vector<1x16x9xf32>
    tpu.vector_store %arg5[%c0_9, %c0_10, %c0_11], %14 {strides = array<i32>} : memref<1x16x9xf32, #tpu.memory_space<vmem>>, vector<1x16x9xf32>,
    return
  }
  func.func @transform_0(%arg0: i32) -> (i32, i32, i32) {
    %c0_i32 = arith.constant 0 : i32
    %c0_i32_0 = arith.constant 0 : i32
    %c0_i32_1 = arith.constant 0 : i32
    return %arg0, %c0_i32, %c0_i32_0 : i32, i32, i32
  }
  func.func @transform_1(%arg0: i32) -> (i32, i32) {
    %c0_i32 = arith.constant 0 : i32
    %c0_i32_0 = arith.constant 0 : i32
    %c0_i32_1 = arith.constant 0 : i32
    return %c0_i32, %c0_i32_0 : i32, i32
  }
  func.func @transform_2(%arg0: i32) -> (i32, i32) {
    %c0_i32 = arith.constant 0 : i32
    %c0_i32_0 = arith.constant 0 : i32
    %c0_i32_1 = arith.constant 0 : i32
    return %c0_i32, %c0_i32_0 : i32, i32
  }
  func.func @transform_3(%arg0: i32) -> (i32, i32) {
    %c0_i32 = arith.constant 0 : i32
    %c0_i32_0 = arith.constant 0 : i32
    %c0_i32_1 = arith.constant 0 : i32
    return %c0_i32, %c0_i32_0 : i32, i32
  }
  func.func @transform_4(%arg0: i32) -> (i32, i32, i32) {
    %c0_i32 = arith.constant 0 : i32
    %c0_i32_0 = arith.constant 0 : i32
    %c0_i32_1 = arith.constant 0 : i32
    return %arg0, %c0_i32, %c0_i32_0 : i32, i32, i32
  }
}

module attributes {stable_mosaic.version = 11 : i64} {
  func.func @_fused_attn_kernel(%arg0: i32, %arg1: memref<1x16x16xf32, #tpu.memory_space<vmem>>, %arg2: memref<1x16x9xf32, #tpu.memory_space<vmem>>, %arg3: memref<1x16x9xf32, #tpu.memory_space<vmem>>, %arg4: memref<16x16xf32, #tpu.memory_space<vmem>>, %arg5: memref<16x1xf32, #tpu.memory_space<vmem>>, %arg6: memref<32x16xf32, #tpu.memory_space<vmem>>, %arg7: memref<32x1xf32, #tpu.memory_space<vmem>>, %arg8: memref<1x16x16xf32, #tpu.memory_space<vmem>>) attributes {dimension_semantics = [#tpu.dimension_semantics<parallel>], iteration_bounds = array<i64: 2>, scalar_prefetch = 0 : i64, scratch_operands = 0 : i64, tpu.core_type = #tpu.core_type<tc>, window_params = [{transform_indices = @transform_0, window_bounds = array<i64: 1, 16, 16>}, {transform_indices = @transform_1, window_bounds = array<i64: 1, 16, 9>}, {transform_indices = @transform_2, window_bounds = array<i64: 1, 16, 9>}, {pipeline_mode = #tpu.pipeline_mode<synchronous>, transform_indices = @transform_3, window_bounds = array<i64: 16, 16>}, {pipeline_mode = #tpu.pipeline_mode<synchronous>, transform_indices = @transform_4, window_bounds = array<i64: 16, 1>}, {pipeline_mode = #tpu.pipeline_mode<synchronous>, transform_indices = @transform_5, window_bounds = array<i64: 32, 16>}, {pipeline_mode = #tpu.pipeline_mode<synchronous>, transform_indices = @transform_6, window_bounds = array<i64: 32, 1>}, {transform_indices = @transform_7, window_bounds = array<i64: 1, 16, 16>}]} {
    %c0 = arith.constant 0 : index
    %c0_0 = arith.constant 0 : index
    %0 = vector.load %arg4[%c0, %c0_0] : memref<16x16xf32, #tpu.memory_space<vmem>>, vector<16x16xf32>
    %c0_1 = arith.constant 0 : index
    %c0_2 = arith.constant 0 : index
    %c0_3 = arith.constant 0 : index
    %1 = vector.load %arg1[%c0_1, %c0_2, %c0_3] : memref<1x16x16xf32, #tpu.memory_space<vmem>>, vector<1x16x16xf32>
    %2 = vector.shape_cast %1 : vector<1x16x16xf32> to vector<16x16xf32>
    %cst = arith.constant dense<0.000000e+00> : vector<16x16xf32>
    %3 = tpu.matmul %0, %2, %cst {dimension_numbers = #tpu.dot_dimension_numbers<[1], [0], [0], [1], [0, 0, 1, 1], [], []>} : vector<16x16xf32>, vector<16x16xf32>, vector<16x16xf32> -> vector<16x16xf32>
    %c0_4 = arith.constant 0 : index
    %c0_5 = arith.constant 0 : index
    %4 = vector.load %arg5[%c0_4, %c0_5] : memref<16x1xf32, #tpu.memory_space<vmem>>, vector<16x1xf32>
    %5 = vector.broadcast %4 : vector<16x1xf32> to vector<16x16xf32>
    %6 = arith.addf %3, %5 : vector<16x16xf32>
    %c0_6 = arith.constant 0 : index
    %c0_7 = arith.constant 0 : index
    %c0_8 = arith.constant 0 : index
    %7 = vector.load %arg3[%c0_6, %c0_7, %c0_8] : memref<1x16x9xf32, #tpu.memory_space<vmem>>, vector<1x16x9xf32>
    %8 = vector.shape_cast %7 : vector<1x16x9xf32> to vector<16x9xf32>
    %c0_9 = arith.constant 0 : index
    %c0_10 = arith.constant 0 : index
    %c0_11 = arith.constant 0 : index
    %9 = vector.load %arg2[%c0_9, %c0_10, %c0_11] : memref<1x16x9xf32, #tpu.memory_space<vmem>>, vector<1x16x9xf32>
    %10 = vector.shape_cast %9 : vector<1x16x9xf32> to vector<16x9xf32>
    %11 = arith.addf %8, %10 : vector<16x9xf32>
    %c0_12 = arith.constant 0 : index
    %c0_13 = arith.constant 0 : index
    %12 = vector.load %arg6[%c0_12, %c0_13] : memref<32x16xf32, #tpu.memory_space<vmem>>, vector<32x16xf32>
    %cst_14 = arith.constant dense<0.000000e+00> : vector<32x9xf32>
    %13 = tpu.matmul %12, %11, %cst_14 {dimension_numbers = #tpu.dot_dimension_numbers<[1], [0], [0], [1], [0, 0, 1, 1], [], []>} : vector<32x16xf32>, vector<16x9xf32>, vector<32x9xf32> -> vector<32x9xf32>
    %c0_15 = arith.constant 0 : index
    %c0_16 = arith.constant 0 : index
    %14 = vector.load %arg7[%c0_15, %c0_16] : memref<32x1xf32, #tpu.memory_space<vmem>>, vector<32x1xf32>
    %15 = vector.broadcast %14 : vector<32x1xf32> to vector<32x9xf32>
    %16 = arith.addf %13, %15 : vector<32x9xf32>
    %17 = vector.extract_strided_slice %16 {offsets = [0, 0], sizes = [16, 9], strides = [1, 1]} : vector<32x9xf32> to vector<16x9xf32>
    %18 = vector.extract_strided_slice %16 {offsets = [16, 0], sizes = [16, 9], strides = [1, 1]} : vector<32x9xf32> to vector<16x9xf32>
    %19 = vector.extract_strided_slice %6 {offsets = [0, 0], sizes = [4, 16], strides = [1, 1]} : vector<16x16xf32> to vector<4x16xf32>
    %20 = vector.extract_strided_slice %17 {offsets = [0, 0], sizes = [4, 9], strides = [1, 1]} : vector<16x9xf32> to vector<4x9xf32>
    %21 = vector.extract_strided_slice %18 {offsets = [0, 0], sizes = [4, 9], strides = [1, 1]} : vector<16x9xf32> to vector<4x9xf32>
    %cst_17 = arith.constant dense<0.000000e+00> : vector<16x9xf32>
    %22 = tpu.matmul %19, %20, %cst_17 {dimension_numbers = #tpu.dot_dimension_numbers<[0], [0], [1], [1], [0, 1, 1, 1], [], []>} : vector<4x16xf32>, vector<4x9xf32>, vector<16x9xf32> -> vector<16x9xf32>
    %cst_18 = arith.constant 5.000000e-01 : f32
    %23 = vector.broadcast %cst_18 : f32 to vector<16x9xf32>
    %24 = arith.mulf %22, %23 : vector<16x9xf32>
    %cst_19 = arith.constant dense<0xFF800000> : vector<16xf32>
    %25 = vector.multi_reduction <maximumf>, %24, %cst_19 [1] : vector<16x9xf32> to vector<16xf32>
    %26 = vector.shape_cast %25 : vector<16xf32> to vector<16x1xf32>
    %27 = vector.broadcast %26 : vector<16x1xf32> to vector<16x9xf32>
    %28 = arith.subf %24, %27 : vector<16x9xf32>
    %29 = math.exp %28 : vector<16x9xf32>
    %cst_20 = arith.constant dense<0.000000e+00> : vector<16xf32>
    %30 = vector.multi_reduction <add>, %29, %cst_20 [1] : vector<16x9xf32> to vector<16xf32>
    %31 = vector.shape_cast %30 : vector<16xf32> to vector<16x1xf32>
    %32 = tpu.reciprocal %31 {approx = true} : vector<16x1xf32> -> vector<16x1xf32>
    %33 = vector.broadcast %32 : vector<16x1xf32> to vector<16x9xf32>
    %34 = arith.mulf %29, %33 : vector<16x9xf32>
    %cst_21 = arith.constant dense<0.000000e+00> : vector<4x16xf32>
    %35 = tpu.matmul %21, %34, %cst_21 {dimension_numbers = #tpu.dot_dimension_numbers<[1], [1], [0], [0], [0, 0, 1, 0], [], []>} : vector<4x9xf32>, vector<16x9xf32>, vector<4x16xf32> -> vector<4x16xf32>
    %c0_22 = arith.constant 0 : index
    %c0_23 = arith.constant 0 : index
    %c0_24 = arith.constant 0 : index
    %36 = vector.load %arg8[%c0_22, %c0_23, %c0_24] : memref<1x16x16xf32, #tpu.memory_space<vmem>>, vector<1x4x16xf32>
    %37 = vector.shape_cast %36 : vector<1x4x16xf32> to vector<4x16xf32>
    %38 = vector.shape_cast %35 : vector<4x16xf32> to vector<1x4x16xf32>
    tpu.vector_store %arg8[%c0_22, %c0_23, %c0_24], %38 {strides = array<i32>} : memref<1x16x16xf32, #tpu.memory_space<vmem>>, vector<1x4x16xf32>,
    %39 = vector.extract_strided_slice %6 {offsets = [4, 0], sizes = [4, 16], strides = [1, 1]} : vector<16x16xf32> to vector<4x16xf32>
    %40 = vector.extract_strided_slice %17 {offsets = [4, 0], sizes = [4, 9], strides = [1, 1]} : vector<16x9xf32> to vector<4x9xf32>
    %41 = vector.extract_strided_slice %18 {offsets = [4, 0], sizes = [4, 9], strides = [1, 1]} : vector<16x9xf32> to vector<4x9xf32>
    %cst_25 = arith.constant dense<0.000000e+00> : vector<16x9xf32>
    %42 = tpu.matmul %39, %40, %cst_25 {dimension_numbers = #tpu.dot_dimension_numbers<[0], [0], [1], [1], [0, 1, 1, 1], [], []>} : vector<4x16xf32>, vector<4x9xf32>, vector<16x9xf32> -> vector<16x9xf32>
    %cst_26 = arith.constant 5.000000e-01 : f32
    %43 = vector.broadcast %cst_26 : f32 to vector<16x9xf32>
    %44 = arith.mulf %42, %43 : vector<16x9xf32>
    %cst_27 = arith.constant dense<0xFF800000> : vector<16xf32>
    %45 = vector.multi_reduction <maximumf>, %44, %cst_27 [1] : vector<16x9xf32> to vector<16xf32>
    %46 = vector.shape_cast %45 : vector<16xf32> to vector<16x1xf32>
    %47 = vector.broadcast %46 : vector<16x1xf32> to vector<16x9xf32>
    %48 = arith.subf %44, %47 : vector<16x9xf32>
    %49 = math.exp %48 : vector<16x9xf32>
    %cst_28 = arith.constant dense<0.000000e+00> : vector<16xf32>
    %50 = vector.multi_reduction <add>, %49, %cst_28 [1] : vector<16x9xf32> to vector<16xf32>
    %51 = vector.shape_cast %50 : vector<16xf32> to vector<16x1xf32>
    %52 = tpu.reciprocal %51 {approx = true} : vector<16x1xf32> -> vector<16x1xf32>
    %53 = vector.broadcast %52 : vector<16x1xf32> to vector<16x9xf32>
    %54 = arith.mulf %49, %53 : vector<16x9xf32>
    %cst_29 = arith.constant dense<0.000000e+00> : vector<4x16xf32>
    %55 = tpu.matmul %41, %54, %cst_29 {dimension_numbers = #tpu.dot_dimension_numbers<[1], [1], [0], [0], [0, 0, 1, 0], [], []>} : vector<4x9xf32>, vector<16x9xf32>, vector<4x16xf32> -> vector<4x16xf32>
    %c0_30 = arith.constant 0 : index
    %c4 = arith.constant 4 : index
    %c0_31 = arith.constant 0 : index
    %56 = vector.load %arg8[%c0_30, %c4, %c0_31] : memref<1x16x16xf32, #tpu.memory_space<vmem>>, vector<1x4x16xf32>
    %57 = vector.shape_cast %56 : vector<1x4x16xf32> to vector<4x16xf32>
    %58 = vector.shape_cast %55 : vector<4x16xf32> to vector<1x4x16xf32>
    tpu.vector_store %arg8[%c0_30, %c4, %c0_31], %58 {strides = array<i32>} : memref<1x16x16xf32, #tpu.memory_space<vmem>>, vector<1x4x16xf32>,
    %59 = vector.extract_strided_slice %6 {offsets = [8, 0], sizes = [4, 16], strides = [1, 1]} : vector<16x16xf32> to vector<4x16xf32>
    %60 = vector.extract_strided_slice %17 {offsets = [8, 0], sizes = [4, 9], strides = [1, 1]} : vector<16x9xf32> to vector<4x9xf32>
    %61 = vector.extract_strided_slice %18 {offsets = [8, 0], sizes = [4, 9], strides = [1, 1]} : vector<16x9xf32> to vector<4x9xf32>
    %cst_32 = arith.constant dense<0.000000e+00> : vector<16x9xf32>
    %62 = tpu.matmul %59, %60, %cst_32 {dimension_numbers = #tpu.dot_dimension_numbers<[0], [0], [1], [1], [0, 1, 1, 1], [], []>} : vector<4x16xf32>, vector<4x9xf32>, vector<16x9xf32> -> vector<16x9xf32>
    %cst_33 = arith.constant 5.000000e-01 : f32
    %63 = vector.broadcast %cst_33 : f32 to vector<16x9xf32>
    %64 = arith.mulf %62, %63 : vector<16x9xf32>
    %cst_34 = arith.constant dense<0xFF800000> : vector<16xf32>
    %65 = vector.multi_reduction <maximumf>, %64, %cst_34 [1] : vector<16x9xf32> to vector<16xf32>
    %66 = vector.shape_cast %65 : vector<16xf32> to vector<16x1xf32>
    %67 = vector.broadcast %66 : vector<16x1xf32> to vector<16x9xf32>
    %68 = arith.subf %64, %67 : vector<16x9xf32>
    %69 = math.exp %68 : vector<16x9xf32>
    %cst_35 = arith.constant dense<0.000000e+00> : vector<16xf32>
    %70 = vector.multi_reduction <add>, %69, %cst_35 [1] : vector<16x9xf32> to vector<16xf32>
    %71 = vector.shape_cast %70 : vector<16xf32> to vector<16x1xf32>
    %72 = tpu.reciprocal %71 {approx = true} : vector<16x1xf32> -> vector<16x1xf32>
    %73 = vector.broadcast %72 : vector<16x1xf32> to vector<16x9xf32>
    %74 = arith.mulf %69, %73 : vector<16x9xf32>
    %cst_36 = arith.constant dense<0.000000e+00> : vector<4x16xf32>
    %75 = tpu.matmul %61, %74, %cst_36 {dimension_numbers = #tpu.dot_dimension_numbers<[1], [1], [0], [0], [0, 0, 1, 0], [], []>} : vector<4x9xf32>, vector<16x9xf32>, vector<4x16xf32> -> vector<4x16xf32>
    %c0_37 = arith.constant 0 : index
    %c8 = arith.constant 8 : index
    %c0_38 = arith.constant 0 : index
    %76 = vector.load %arg8[%c0_37, %c8, %c0_38] : memref<1x16x16xf32, #tpu.memory_space<vmem>>, vector<1x4x16xf32>
    %77 = vector.shape_cast %76 : vector<1x4x16xf32> to vector<4x16xf32>
    %78 = vector.shape_cast %75 : vector<4x16xf32> to vector<1x4x16xf32>
    tpu.vector_store %arg8[%c0_37, %c8, %c0_38], %78 {strides = array<i32>} : memref<1x16x16xf32, #tpu.memory_space<vmem>>, vector<1x4x16xf32>,
    %79 = vector.extract_strided_slice %6 {offsets = [12, 0], sizes = [4, 16], strides = [1, 1]} : vector<16x16xf32> to vector<4x16xf32>
    %80 = vector.extract_strided_slice %17 {offsets = [12, 0], sizes = [4, 9], strides = [1, 1]} : vector<16x9xf32> to vector<4x9xf32>
    %81 = vector.extract_strided_slice %18 {offsets = [12, 0], sizes = [4, 9], strides = [1, 1]} : vector<16x9xf32> to vector<4x9xf32>
    %cst_39 = arith.constant dense<0.000000e+00> : vector<16x9xf32>
    %82 = tpu.matmul %79, %80, %cst_39 {dimension_numbers = #tpu.dot_dimension_numbers<[0], [0], [1], [1], [0, 1, 1, 1], [], []>} : vector<4x16xf32>, vector<4x9xf32>, vector<16x9xf32> -> vector<16x9xf32>
    %cst_40 = arith.constant 5.000000e-01 : f32
    %83 = vector.broadcast %cst_40 : f32 to vector<16x9xf32>
    %84 = arith.mulf %82, %83 : vector<16x9xf32>
    %cst_41 = arith.constant dense<0xFF800000> : vector<16xf32>
    %85 = vector.multi_reduction <maximumf>, %84, %cst_41 [1] : vector<16x9xf32> to vector<16xf32>
    %86 = vector.shape_cast %85 : vector<16xf32> to vector<16x1xf32>
    %87 = vector.broadcast %86 : vector<16x1xf32> to vector<16x9xf32>
    %88 = arith.subf %84, %87 : vector<16x9xf32>
    %89 = math.exp %88 : vector<16x9xf32>
    %cst_42 = arith.constant dense<0.000000e+00> : vector<16xf32>
    %90 = vector.multi_reduction <add>, %89, %cst_42 [1] : vector<16x9xf32> to vector<16xf32>
    %91 = vector.shape_cast %90 : vector<16xf32> to vector<16x1xf32>
    %92 = tpu.reciprocal %91 {approx = true} : vector<16x1xf32> -> vector<16x1xf32>
    %93 = vector.broadcast %92 : vector<16x1xf32> to vector<16x9xf32>
    %94 = arith.mulf %89, %93 : vector<16x9xf32>
    %cst_43 = arith.constant dense<0.000000e+00> : vector<4x16xf32>
    %95 = tpu.matmul %81, %94, %cst_43 {dimension_numbers = #tpu.dot_dimension_numbers<[1], [1], [0], [0], [0, 0, 1, 0], [], []>} : vector<4x9xf32>, vector<16x9xf32>, vector<4x16xf32> -> vector<4x16xf32>
    %c0_44 = arith.constant 0 : index
    %c12 = arith.constant 12 : index
    %c0_45 = arith.constant 0 : index
    %96 = vector.load %arg8[%c0_44, %c12, %c0_45] : memref<1x16x16xf32, #tpu.memory_space<vmem>>, vector<1x4x16xf32>
    %97 = vector.shape_cast %96 : vector<1x4x16xf32> to vector<4x16xf32>
    %98 = vector.shape_cast %95 : vector<4x16xf32> to vector<1x4x16xf32>
    tpu.vector_store %arg8[%c0_44, %c12, %c0_45], %98 {strides = array<i32>} : memref<1x16x16xf32, #tpu.memory_space<vmem>>, vector<1x4x16xf32>,
    return
  }
  func.func @transform_0(%arg0: i32) -> (i32, i32, i32) {
    %c0_i32 = arith.constant 0 : i32
    %c0_i32_0 = arith.constant 0 : i32
    %c0_i32_1 = arith.constant 0 : i32
    return %arg0, %c0_i32, %c0_i32_0 : i32, i32, i32
  }
  func.func @transform_1(%arg0: i32) -> (i32, i32, i32) {
    %c0_i32 = arith.constant 0 : i32
    %c0_i32_0 = arith.constant 0 : i32
    %c0_i32_1 = arith.constant 0 : i32
    return %arg0, %c0_i32, %c0_i32_0 : i32, i32, i32
  }
  func.func @transform_2(%arg0: i32) -> (i32, i32, i32) {
    %c0_i32 = arith.constant 0 : i32
    %c0_i32_0 = arith.constant 0 : i32
    %c0_i32_1 = arith.constant 0 : i32
    return %arg0, %c0_i32, %c0_i32_0 : i32, i32, i32
  }
  func.func @transform_3(%arg0: i32) -> (i32, i32) {
    %c0_i32 = arith.constant 0 : i32
    %c0_i32_0 = arith.constant 0 : i32
    %c0_i32_1 = arith.constant 0 : i32
    return %c0_i32, %c0_i32_0 : i32, i32
  }
  func.func @transform_4(%arg0: i32) -> (i32, i32) {
    %c0_i32 = arith.constant 0 : i32
    %c0_i32_0 = arith.constant 0 : i32
    %c0_i32_1 = arith.constant 0 : i32
    return %c0_i32, %c0_i32_0 : i32, i32
  }
  func.func @transform_5(%arg0: i32) -> (i32, i32) {
    %c0_i32 = arith.constant 0 : i32
    %c0_i32_0 = arith.constant 0 : i32
    %c0_i32_1 = arith.constant 0 : i32
    return %c0_i32, %c0_i32_0 : i32, i32
  }
  func.func @transform_6(%arg0: i32) -> (i32, i32) {
    %c0_i32 = arith.constant 0 : i32
    %c0_i32_0 = arith.constant 0 : i32
    %c0_i32_1 = arith.constant 0 : i32
    return %c0_i32, %c0_i32_0 : i32, i32
  }
  func.func @transform_7(%arg0: i32) -> (i32, i32, i32) {
    %c0_i32 = arith.constant 0 : i32
    %c0_i32_0 = arith.constant 0 : i32
    %c0_i32_1 = arith.constant 0 : i32
    return %arg0, %c0_i32, %c0_i32_0 : i32, i32, i32
  }
}

</mosaic_0001>

<bundles_post_ra>
// kernel: attention_forward.2
= control target key start
LH: loop header
LB: loop body
LE: loop exit
PB: predicated region body
PF: predicated region fallthrough
CT: control target
= control target key end

     0   :  { %s380_s15 = smov 0   ;;  %s415_s0 = inlined_call_operand.vmem [shape: f32[2,16,9], index: 0, kind: input, shape index: {}]   ;;  %s416_s1 = inlined_call_operand.vmem [shape: f32[16,16], index: 1, kind: input, shape index: {}]   ;;  %s417_s2 = inlined_call_operand.vmem [shape: f32[16,1], index: 2, kind: input, shape index: {}]   ;;  %s418_s3 = inlined_call_operand.vmem [shape: f32[16,1], index: 3, kind: input, shape index: {}]   ;;  %s419_s4 = inlined_call_operand.vmem [shape: f32[2,16,9], index: 4, kind: output, shape index: {}]  }
   0x1 LB: > { %s318_s16 = sadd.s32 4294967295, %s352_s15   ;;  %p322_p0 = scmp.ge.s32.totalorder %s352_s15, 1  ;;  %s352_s15 = sphi %s380_s15, %s14_s15  }
   0x2   : > { %p162_p1 = scmp.lt.s32.totalorder %s352_s15, 3 }
   0x4   : > { %p163_p2 = pnand %p322_p0, %p162_p1 }
   0x5   : > { %p188_p3 = scmp.lt.s32.totalorder (!%p163_p2), %s318_s16, 1 }
   0x6   : > { %166 = sbr.rel (%p163_p2) target bundleno = 271 (0x10f), region = 36 }
   0xb   : > { %v201_v0 = vld [vmem:[%s417_s2 + $0x8] sm:$0xff]  ;;  %v354_v1 = vmov 0   ;;  %v200_v2 = vld [vmem:[%s417_s2] sm:$0xff]  ;;  %s421_s16 = smov (!%p188_p3, %s318_s16), 1  ;;  %vm230_vm0 = vcmask 130048   ;;  %vm260_vm1 = vcmask 72704  }
   0xc   : > { %344 = vset.pattern.permute.xlu0 %v354_v1  ;;  %345 = vset.pattern.permute.xlu1 %v354_v1  ;;  %v218_v3 = vld [vmem:[%s418_s3] sm:$0xff]  ;;  %v219_v4 = vld [vmem:[%s418_s3 + $0x8] sm:$0xff]  ;;  %s331_s25 = sshll.u32 %s421_s16, 4 }
   0xd   : > { %209 = vperm.xlu0 %344, %v201_v0   ;;  %222 = vperm.xlu1 %345, %v218_v3   ;;  %s192_s28 = scalar_lea.vmem %s415_s0, %s331_s25  ;;  %v216_v13 = vld [vmem:[%s416_s1] sm:$0xff]  ;;  %v217_v14 = vld [vmem:[%s416_s1 + $0x8] sm:$0xff]  ;;  %s197_s9 = scalar_lea.vmem %s419_s4, %s331_s25 }
   0xe   : > { %v199_v5 = vld [vmem:[%s192_s28 + $0x8] sm:$0xff]  ;;  %v198_v9 = vld [vmem:[%s192_s28] sm:$0xff] }
  0x15   : > { %204 = vperm.xlu0 %344, %v200_v2   ;;  %227 = vperm.xlu1 %345, %v219_v4  }
  0x7f   : > { %v210_v6 = vpop.permute.xlu0 %209  ;;  %v223_v15 = vpop.permute.xlu1 %222 }
  0x80   : > { %v213_v7 = vadd.f32 %v210_v6, %v199_v5 }
  0x82   : > { %v215_v8 = vmax.f32 %v213_v7, 0.0 }
  0x84   : > { %251 = vmatpush.msra.mxu0 %v215_v8  ;;  %333 = vmatpush.msra.mxu1 %v215_v8 }
  0x87   : > { %v205_v10 = vpop.permute.xlu0 %204  ;;  %v228_v16 = vpop.permute.xlu1 %227 }
  0x88   : > { %v212_v11 = vadd.f32 %v205_v10, %v198_v9 }
  0x8a   : > { %v214_v12 = vmax.f32 %v212_v11, 0.0 }
  0x8c   : > { %252 = vmatpush.msra.mxu0 %v214_v12  ;;  %334 = vmatpush.msra.mxu1 %v214_v12 }
  0x8d   : > { %327 = vmatmul.msk.f32.vlgmr.msra.gmra.mxu0 %vm230_vm0, %v216_v13  ;;  %328 = vmatmul.msk.f32.vlgmr.msra.gmra.mxu1 %vm230_vm0, %v217_v14 }
 0x10a   : > { %v254_v17 = vpop.f32.mrf.mxu0  ;;  %v257_v18 = vpop.f32.mrf.mxu1 }
 0x10b   : > { %v255_v19 = vadd.f32 %v254_v17, %v223_v15  ;;  %v258_v20 = vadd.f32 %v257_v18, %v228_v16 }
 0x10d   : > { %261 = vst.msk [vmem:[%s197_s9] sm:$0xff] %vm260_vm1, %v255_v19 }
 0x10e   : > { %262 = vst.msk [vmem:[%s197_s9 + $0x8] sm:$0xff] %vm260_vm1, %v258_v20 }
 0x10f PF: > { %s14_s15 = sadd.s32 1, %s352_s15  }
 0x110   : > { %p11_p4 = scmp.ge.s32.totalorder %s14_s15, 4  }
 0x112   :  { %13 = sbr.rel (!%p11_p4) target bundleno = 1 (0x1), region = 66 }

// kernel: attention_forward.3
= control target key start
LH: loop header
LB: loop body
LE: loop exit
PB: predicated region body
PF: predicated region fallthrough
CT: control target
= control target key end

     0   :  { %s1145_s24 = smov 0   ;;  %s1271_s0 = inlined_call_operand.vmem [shape: f32[2,16,16], index: 0, kind: input, shape index: {}]   ;;  %s1272_s1 = inlined_call_operand.vmem [shape: f32[2,16,9], index: 1, kind: input, shape index: {}]   ;;  %s1273_s2 = inlined_call_operand.vmem [shape: f32[2,16,9], index: 2, kind: input, shape index: {}]   ;;  %s1274_s3 = inlined_call_operand.vmem [shape: f32[16,16], index: 3, kind: input, shape index: {}]   ;;  %s1275_s4 = inlined_call_operand.vmem [shape: f32[16,1], index: 4, kind: input, shape index: {}]   ;;  %s1276_s5 = inlined_call_operand.vmem [shape: f32[32,16], index: 5, kind: input, shape index: {}]   ;;  %s1277_s6 = inlined_call_operand.vmem [shape: f32[32,1], index: 6, kind: input, shape index: {}]   ;;  %s1278_s7 = inlined_call_operand.vmem [shape: f32[2,16,16], index: 7, kind: output, shape index: {}]  }
   0x1 LB: > { %s1001_s25 = sadd.s32 4294967295, %s1102_s24   ;;  %p1005_p0 = scmp.ge.s32.totalorder %s1102_s24, 1  ;;  %s1102_s24 = sphi %s1145_s24, %s17_s24  }
   0x2   : > { %p257_p1 = scmp.lt.s32.totalorder %s1102_s24, 3 }
   0x4   : > { %p258_p2 = pnand %p1005_p0, %p257_p1 }
   0x5   : > { %p299_p3 = scmp.lt.s32.totalorder (!%p258_p2), %s1001_s25, 1 }
   0x6   : > { %261 = sbr.rel (%p258_p2) target bundleno = 1478 (0x5c6), region = 48 }
   0xb   : > { %v323_v0 = vld [vmem:[%s1275_s4] sm:$0xff]  ;;  %v1104_v1 = vmov 0   ;;  %s1280_s25 = smov (!%p299_p3, %s1001_s25), 1  ;;  %vm335_vm0 = vcmask 130048   ;;  %vm479_vm1 = vcmask 1043456   ;;  %vm472_vm2 = vcmask 31744  }
   0xc   : > { %1061 = vset.pattern.permute.xlu0 %v1104_v1  ;;  %1062 = vset.pattern.permute.xlu2 %v1104_v1  ;;  %s1156_s28 = sshll.u32 %s1280_s25, 4  ;;  %v319_v2 = vld [vmem:[%s1274_s3] sm:$0xff]  ;;  %v372_v23 = vld [vmem:[%s1276_s5 + $0x8] sm:$0xff]  ;;  %v373_v25 = vld [vmem:[%s1276_s5 + $0x10] sm:$0xff]  ;;  %vm508_vm3 = vcmask 72704   ;;  %vm560_vm4 = vcmask 125952  }
   0xd   : > { %327 = vperm.xlu0 %1061, %v323_v0   ;;  %s303_s8 = scalar_lea.vmem %s1271_s0, %s1156_s28  ;;  %s308_s11 = scalar_lea.vmem %s1272_s1, %s1156_s28  ;;  %v375_v11 = vld [vmem:[%s1277_s6] sm:$0xff]  ;;  %v320_v24 = vld [vmem:[%s1274_s3 + $0x8] sm:$0xff]  ;;  %v377_v34 = vld [vmem:[%s1277_s6 + $0x10] sm:$0xff] }
   0xe   : > { %v322_v3 = vld [vmem:[%s303_s8 + $0x8] sm:$0xff]  ;;  %v321_v4 = vld [vmem:[%s303_s8] sm:$0xff]  ;;  %s313_s16 = scalar_lea.vmem %s1273_s2, %s1156_s28  ;;  %s1231_s14 = scalar_lea.vmem %s1278_s7, %s1156_s28 }
   0xf   : > { %v368_v5 = vld [vmem:[%s308_s11 + $0x8] sm:$0xff]  ;;  %356 = vmatpush.msra.mxu0 %v322_v3  ;;  %v365_v7 = vld [vmem:[%s313_s16] sm:$0xff] }
  0x10   : > { %v366_v6 = vld [vmem:[%s313_s16 + $0x8] sm:$0xff]  ;;  %v367_v8 = vld [vmem:[%s308_s11] sm:$0xff] }
  0x11   : > { %v370_v9 = vadd.f32 %v368_v5, %v366_v6  ;;  %v369_v10 = vadd.f32 %v367_v8, %v365_v7  ;;  %357 = vmatpush.msra.mxu0 %v321_v4  ;;  %v371_v12 = vld [vmem:[%s1276_s5] sm:$0xff]  ;;  %v324_v32 = vld [vmem:[%s1275_s4 + $0x8] sm:$0xff] }
  0x12   : > { %1014 = vmatmul.msk.f32.vlgmr.msra.gmra.mxu0 %vm335_vm0, %v319_v2  ;;  %v376_v33 = vld [vmem:[%s1277_s6 + $0x8] sm:$0xff] }
  0x13   : > { %425 = vmatpush.msra.mxu1 %v370_v9 }
  0x15   : > { %381 = vperm.xlu0 %1061, %v375_v11   ;;  %426 = vmatpush.msra.mxu1 %v369_v10 }
  0x16   : > { %1016 = vmatmul.msk.f32.vlgmr.msra.gmra.mxu1 %vm335_vm0, %v371_v12 }
  0x1a   : > { %1015 = vmatmul.msk.f32.gmra.mxu0 %vm335_vm0, %v320_v24 }
  0x1e   : > { %1017 = vmatmul.msk.f32.gmra.mxu1 %vm335_vm0, %v372_v23 }
  0x26   : > { %1018 = vmatmul.msk.f32.gmra.mxu1 %vm335_vm0, %v373_v25 }
  0x7f   : > { %v328_v13 = vpop.permute.xlu0 %327 }
  0x87   : > { %v382_v16 = vpop.permute.xlu0 %381 }
  0x8f   : > { %v359_v14 = vpop.f32.mrf.mxu0 }
  0x90   : > { %v360_v15 = vadd.f32 %v359_v14, %v328_v13 }
  0x92   : > { %v563_v17 = vrot.slane %v360_v15, 4  ;;  %440 = vxpose.xlu1.b32.start.end [1/1] (short) (narrow) %v360_v15, 16 }
  0x93   : > { %v428_v18 = vpop.f32.mrf.mxu1 }
  0x94   : > { %v429_v19 = vadd.f32 %v428_v18, %v382_v16  ;;  %565 = vxpose.xlu0.b32.start.end [1/1] (short) (narrow) %v563_v17, 16 }
  0x96   : > { %1020 = vmatpush.msk.msra.mxu2 %vm479_vm1, %v429_v19  ;;  %v597_v20 = vrot.slane %v429_v19, 4 }
  0x97   : > { %v362_v52 = vpop.f32.mrf.mxu0 }
  0x98   : > { %1026 = vmatpush.msk.msra.mxu3 %vm479_vm1, %v597_v20 }
  0x9b   : > { %v431_v44 = vpop.f32.mrf.mxu1 }
  0xa3   : > { %v434_v61 = vpop.f32.mrf.mxu1 }
  0xe5   : > { %1063 = vset.pattern.permute.xlu1 %v1104_v1 }
 0x136   : > { %v456_v21 = vpop.trf.xlu1 }
 0x137   : > { %1021 = vmatmul.msk.f32.vlgmr.msra.gmra.mxu2 %vm472_vm2, %v456_v21 }
 0x138   : > { %v581_v50 = vpop.trf.xlu0 }
 0x139   : > { %1027 = vmatmul.msk.f32.vlgmr.msra.gmra.mxu3 %vm472_vm2, %v581_v50 }
 0x13e   : > { %v457_v22 = vpop.trf.xlu1 }
 0x13f   : > { %1022 = vmatmul.msk.f32.gmra.mxu2 %vm472_vm2, %v457_v22 }
 0x140   : > { %v582_v51 = vpop.trf.xlu0 }
 0x141   : > { %1028 = vmatmul.msk.f32.gmra.mxu3 %vm472_vm2, %v582_v51 }
 0x1ba   : > { %v500_v26 = vpop.f32.mrf.mxu2 }
 0x1bb   : > { %v506_v27 = vmul.f32 0.5, %v500_v26 }
 0x1bc   : > { %v623_v0 = vpop.f32.mrf.mxu3 }
 0x1bd   : > { %v509_v28 = vsel %vm508_vm3, %v506_v27, -inf  ;;  %v629_v1 = vmul.f32 0.5, %v623_v0  ;;  %v378_v0 = vld [vmem:[%s1277_s6 + $0x18] sm:$0xff] }
 0x1be   : > { %510 = vmax.xlane.f32.xlu2 %v509_v28 }
 0x1bf   : > { %v631_v2 = vsel %vm508_vm3, %v629_v1, -inf }
 0x1c2   : > { %v503_v29 = vpop.f32.mrf.mxu2 }
 0x1c3   : > { %v507_v30 = vmul.f32 0.5, %v503_v29 }
 0x1c4   : > { %v626_v3 = vpop.f32.mrf.mxu3 }
 0x1c5   : > { %v512_v31 = vsel %vm508_vm3, %v507_v30, -inf  ;;  %v630_v4 = vmul.f32 0.5, %v626_v3 }
 0x1c6   : > { %513 = vmax.xlane.f32.xlu1 %v512_v31 }
 0x1c7   : > { %v634_v5 = vsel %vm508_vm3, %v630_v4, -inf }
 0x1ce   : > { %635 = vmax.xlane.f32.xlu1 %v634_v5 }
 0x1d6   : > { %332 = vperm.xlu2 %1062, %v324_v32  }
 0x1de   : > { %386 = vperm.xlu2 %1062, %v376_v33  }
 0x1e6   : > { %391 = vperm.xlu2 %1062, %v377_v34  }
 0x231   : > { %v511_v35 = vpop.xlane.xlu2 %510 }
 0x232   : > { %v515_v36 = vsub.f32 %v506_v27, %v511_v35 }
 0x234   : > { %v517_v37 = vmul.f32 1.442695, %v515_v36 }
 0x236   : > { %1064 = vpow2.f32 %v517_v37 }
 0x239   : > { %v514_v38 = vpop.xlane.xlu1 %513  ;;  %v333_v39 = vpop.permute.xlu2 %332 }
 0x23a   : > { %v516_v40 = vsub.f32 %v507_v30, %v514_v38  ;;  %v363_v53 = vadd.f32 %v362_v52, %v333_v39 }
 0x23c   : > { %v1065_v41 = vpop.eup %1064  ;;  %v519_v42 = vmul.f32 1.442695, %v516_v40  ;;  %v802_v54 = vrot.slane %v363_v53, 4 }
 0x23d   : > { %v521_v43 = vsel %vm508_vm3, %v1065_v41, 0.0 }
 0x23e   : > { %1066 = vpow2.f32 %v519_v42  ;;  %522 = vadd.xlane.f32.xlu2 %v521_v43 }
 0x241   : > { %v387_v45 = vpop.permute.xlu2 %386  ;;  %v636_v20 = vpop.xlane.xlu1 %635 }
 0x242   : > { %v432_v46 = vadd.f32 %v431_v44, %v387_v45  ;;  %v638_v23 = vsub.f32 %v630_v4, %v636_v20 }
 0x244   : > { %v1067_v47 = vpop.eup %1066  ;;  %1050 = vmatpush.msk.msrb.mxu3 %vm479_vm1, %v432_v46  ;;  %v836_v49 = vrot.slane %v432_v46, 4  ;;  %v641_v25 = vmul.f32 1.442695, %v638_v23 }
 0x245   : > { %v524_v48 = vsel %vm508_vm3, %v1067_v47, 0.0 }
 0x246   : > { %525 = vadd.xlane.f32.xlu0 %v524_v48  ;;  %1038 = vmatpush.msk.msra.mxu3 %vm479_vm1, %v836_v49 }
 0x249   : > { %v392_v55 = vpop.permute.xlu2 %391 }
 0x24a   : > { %v1216_v63 = vadd.f32 %v434_v61, %v392_v55  ;;  %v374_v55 = vld [vmem:[%s1276_s5 + $0x18] sm:$0xff] }
 0x24b   : > { %1019 = vmatmul.msk.f32.gmra.mxu1 %vm335_vm0, %v374_v55 }
 0x267   : > { %804 = vxpose.xlu2.b32.start.end [1/1] (short) (narrow) %v802_v54, 16  ;;  %v653_v54 = vrot.slane %v1216_v63, 4 }
 0x26f   : > { %683 = vxpose.xlu0.b32.start.end [1/1] (short) (narrow) %v363_v53, 16 }
 0x2b1   : > { %v523_v56 = vpop.xlane.xlu2 %522 }
 0x2b9   : > { %v526_v57 = vpop.xlane.xlu0 %525 }
 0x2ba   : > { %1068 = vrcp.f32 %v526_v57 }
 0x2bb   : > { %1070 = vrcp.f32 %v523_v56 }
 0x2c0   : > { %v1069_v58 = vpop.eup %1068 }
 0x2c1   : > { %v530_v59 = vmul.f32 %v1069_v58, %v1067_v47  ;;  %v1071_v60 = vpop.eup %1070 }
 0x2c2   : > { %v529_v62 = vmul.f32 %v1071_v60, %v1065_v41 }
 0x2c3   : > { %1023 = vmatpush.xpose.msk.msrb.mxu0 %vm508_vm3, %v530_v59 }
 0x2c7   : > { %1024 = vmatpush.xpose.msk.msrb.mxu0 %vm508_vm3, %v529_v62 }
 0x2ca   : > { %1025 = vmatmul.msk.f32.vlgmr.msrb.gmra.mxu0 %vm508_vm3, %v1216_v63 }
 0x2cb   : > { %1032 = vmatpush.msk.msra.mxu0 %vm479_vm1, %v432_v46 }
 0x2e8   : > { %632 = vmax.xlane.f32.xlu0 %v631_v2 }
 0x300   : > { %v820_v8 = vpop.trf.xlu2 }
 0x308   : > { %v821_v9 = vpop.trf.xlu2 }
 0x313   : > { %v699_v6 = vpop.trf.xlu0 }
 0x314   : > { %1033 = vmatmul.msk.f32.vlgmr.msra.gmra.mxu0 %vm472_vm2, %v699_v6 }
 0x31b   : > { %v700_v7 = vpop.trf.xlu0 }
 0x31c   : > { %1034 = vmatmul.msk.f32.vlgmr.msrb.gmra.mxu3 %vm472_vm2, %v700_v7 }
 0x324   : > { %1039 = vmatmul.msk.f32.vlgmr.msra.gmra.mxu3 %vm472_vm2, %v820_v8 }
 0x32c   : > { %1040 = vmatmul.msk.f32.gmra.mxu3 %vm472_vm2, %v821_v9 }
 0x347   : > { %v557_v10 = vpop.f32.mrf.mxu0 }
 0x348   : > { %561 = vst.msk [vmem:[%s1231_s14] sm:$0xf] %vm560_vm4, %v557_v10 }
 0x35b   : > { %v633_v14 = vpop.xlane.xlu0 %632 }
 0x35c   : > { %v637_v17 = vsub.f32 %v629_v1, %v633_v14 }
 0x35e   : > { %v639_v19 = vmul.f32 1.442695, %v637_v17 }
 0x360   : > { %1072 = vpow2.f32 %v639_v19 }
 0x361   : > { %1074 = vpow2.f32 %v641_v25 }
 0x366   : > { %v1073_v26 = vpop.eup %1072 }
 0x367   : > { %v643_v27 = vsel %vm508_vm3, %v1073_v26, 0.0  ;;  %v1075_v28 = vpop.eup %1074 }
 0x368   : > { %v646_v29 = vsel %vm508_vm3, %v1075_v28, 0.0 }
 0x391   : > { %v741_v35 = vpop.f32.mrf.mxu0 }
 0x392   : > { %v747_v36 = vmul.f32 0.5, %v741_v35 }
 0x394   : > { %v749_v42 = vsel %vm508_vm3, %v747_v36, -inf }
 0x39f   : > { %v744_v11 = vpop.f32.mrf.mxu3 }
 0x3a0   : > { %v748_v12 = vmul.f32 0.5, %v744_v11  ;;  %v437_v11 = vpop.f32.mrf.mxu1 }
 0x3a2   : > { %v752_v13 = vsel %vm508_vm3, %v748_v12, -inf }
 0x3a3   : > { %753 = vmax.xlane.f32.xlu1 %v752_v13 }
 0x3a7   : > { %v862_v15 = vpop.f32.mrf.mxu3 }
 0x3a8   : > { %v868_v16 = vmul.f32 0.5, %v862_v15 }
 0x3aa   : > { %v870_v18 = vsel %vm508_vm3, %v868_v16, -inf }
 0x3ab   : > { %871 = vmax.xlane.f32.xlu2 %v870_v18 }
 0x3af   : > { %v865_v21 = vpop.f32.mrf.mxu3 }
 0x3b0   : > { %v869_v22 = vmul.f32 0.5, %v865_v21 }
 0x3b2   : > { %v873_v24 = vsel %vm508_vm3, %v869_v22, -inf }
 0x3b3   : > { %874 = vmax.xlane.f32.xlu1 %v873_v24 }
 0x3bb   : > { %644 = vadd.xlane.f32.xlu1 %v643_v27 }
 0x3c3   : > { %647 = vadd.xlane.f32.xlu1 %v646_v29 }
 0x416   : > { %v754_v30 = vpop.xlane.xlu1 %753 }
 0x417   : > { %v756_v31 = vsub.f32 %v748_v12, %v754_v30 }
 0x419   : > { %v759_v32 = vmul.f32 1.442695, %v756_v31 }
 0x41b   : > { %1076 = vpow2.f32 %v759_v32 }
 0x41e   : > { %v872_v37 = vpop.xlane.xlu2 %871 }
 0x41f   : > { %v876_v40 = vsub.f32 %v868_v16, %v872_v37 }
 0x421   : > { %v1077_v33 = vpop.eup %1076  ;;  %v878_v43 = vmul.f32 1.442695, %v876_v40 }
 0x422   : > { %v764_v34 = vsel %vm508_vm3, %v1077_v33, 0.0 }
 0x423   : > { %765 = vadd.xlane.f32.xlu1 %v764_v34 }
 0x426   : > { %v875_v38 = vpop.xlane.xlu1 %874 }
 0x427   : > { %v877_v39 = vsub.f32 %v869_v22, %v875_v38 }
 0x429   : > { %v880_v41 = vmul.f32 1.442695, %v877_v39 }
 0x42b   : > { %1078 = vpow2.f32 %v880_v41  ;;  %750 = vmax.xlane.f32.xlu1 %v749_v42 }
 0x42c   : > { %1080 = vpow2.f32 %v878_v43 }
 0x42e   : > { %v645_v44 = vpop.xlane.xlu1 %644 }
 0x431   : > { %v1079_v45 = vpop.eup %1078 }
 0x432   : > { %v885_v46 = vsel %vm508_vm3, %v1079_v45, 0.0  ;;  %v1081_v48 = vpop.eup %1080 }
 0x433   : > { %886 = vadd.xlane.f32.xlu1 %v885_v46  ;;  %v882_v49 = vsel %vm508_vm3, %v1081_v48, 0.0 }
 0x436   : > { %v648_v47 = vpop.xlane.xlu1 %647 }
 0x437   : > { %1082 = vrcp.f32 %v648_v47 }
 0x438   : > { %1084 = vrcp.f32 %v645_v44 }
 0x43b   : > { %883 = vadd.xlane.f32.xlu1 %v882_v49 }
 0x43d   : > { %v1083_v50 = vpop.eup %1082 }
 0x43e   : > { %v652_v51 = vmul.f32 %v1083_v50, %v1075_v28  ;;  %v1085_v52 = vpop.eup %1084 }
 0x43f   : > { %v651_v53 = vmul.f32 %v1085_v52, %v1073_v26 }
 0x440   : > { %1029 = vmatpush.xpose.msk.msrb.mxu2 %vm508_vm3, %v652_v51 }
 0x444   : > { %1030 = vmatpush.xpose.msk.msrb.mxu2 %vm508_vm3, %v651_v53 }
 0x447   : > { %1031 = vmatmul.msk.f32.vlgmr.msrb.gmra.mxu2 %vm508_vm3, %v653_v54 }
 0x496   : > { %v766_v56 = vpop.xlane.xlu1 %765 }
 0x497   : > { %1086 = vrcp.f32 %v766_v56 }
 0x49d   : > { %v1087_v57 = vpop.eup %1086 }
 0x49e   : > { %v770_v58 = vmul.f32 %v1087_v57, %v1077_v33  ;;  %v751_v59 = vpop.xlane.xlu1 %750 }
 0x49f   : > { %v755_v60 = vsub.f32 %v747_v36, %v751_v59 }
 0x4a0   : > { %1035 = vmatpush.xpose.msk.msra.mxu2 %vm508_vm3, %v770_v58 }
 0x4a1   : > { %v757_v61 = vmul.f32 1.442695, %v755_v60 }
 0x4a3   : > { %1088 = vpow2.f32 %v757_v61 }
 0x4a6   : > { %v887_v2 = vpop.xlane.xlu1 %886 }
 0x4a7   : > { %1090 = vrcp.f32 %v887_v2 }
 0x4a9   : > { %v1089_v62 = vpop.eup %1088 }
 0x4aa   : > { %v761_v63 = vsel %vm508_vm3, %v1089_v62, 0.0 }
 0x4ab   : > { %762 = vadd.xlane.f32.xlu1 %v761_v63 }
 0x4ad   : > { %v1091_v5 = vpop.eup %1090 }
 0x4ae   : > { %v884_v3 = vpop.xlane.xlu1 %883  ;;  %v891_v8 = vmul.f32 %v1091_v5, %v1079_v45 }
 0x4c4   : > { %396 = vperm.xlu1 %1063, %v378_v0  }
 0x4ca   : > { %v679_v1 = vpop.f32.mrf.mxu2 }
 0x4cb   : > { %682 = vst.msk [vmem:[%s1231_s14 + $0x4] sm:$0xf] %vm560_vm4, %v679_v1 }
 0x51e   : > { %v763_v4 = vpop.xlane.xlu1 %762 }
 0x51f   : > { %1092 = vrcp.f32 %v763_v4 }
 0x520   : > { %1094 = vrcp.f32 %v884_v3 }
 0x525   : > { %v1093_v6 = vpop.eup %1092 }
 0x526   : > { %v769_v7 = vmul.f32 %v1093_v6, %v1089_v62  ;;  %v1095_v9 = vpop.eup %1094 }
 0x527   : > { %v890_v10 = vmul.f32 %v1095_v9, %v1081_v48 }
 0x528   : > { %1036 = vmatpush.xpose.msk.msra.mxu2 %vm508_vm3, %v769_v7 }
 0x52c   : > { %1041 = vmatpush.xpose.msk.msrb.mxu2 %vm508_vm3, %v891_v8 }
 0x530   : > { %1042 = vmatpush.xpose.msk.msrb.mxu2 %vm508_vm3, %v890_v10 }
 0x536   : > { %v397_v12 = vpop.permute.xlu1 %396 }
 0x537   : > { %v438_v13 = vadd.f32 %v437_v11, %v397_v12 }
 0x539   : > { %1037 = vmatmul.msk.f32.vlgmr.msra.gmra.mxu2 %vm508_vm3, %v438_v13  ;;  %v892_v14 = vrot.slane %v438_v13, 4 }
 0x541   : > { %1043 = vmatmul.msk.f32.vlgmr.msrb.gmra.mxu2 %vm508_vm3, %v892_v14 }
 0x5bc   : > { %v797_v15 = vpop.f32.mrf.mxu2 }
 0x5bd   : > { %800 = vst.msk [vmem:[%s1231_s14 + $0x8] sm:$0xf] %vm560_vm4, %v797_v15 }
 0x5c4   : > { %v918_v16 = vpop.f32.mrf.mxu2 }
 0x5c5   : > { %921 = vst.msk [vmem:[%s1231_s14 + $0xc] sm:$0xf] %vm560_vm4, %v918_v16 }
 0x5c6 PF: > { %s17_s24 = sadd.s32 1, %s1102_s24  }
 0x5c7   : > { %p14_p4 = scmp.ge.s32.totalorder %s17_s24, 4  }
 0x5c9   :  { %16 = sbr.rel (!%p14_p4) target bundleno = 1 (0x1), region = 84 }

</bundles_post_ra>
